<compile_context>
chip_gen: v7x
topology: tpu7x:2x2x1
jax: 0.10.0
libtpu: 0.0.40
codegen_flags: <defaults>
</compile_context>

<pallas_src>
import math

import jax
import jax.numpy as jnp
from jax.experimental import pallas as pl
from jax.experimental.pallas import tpu as pltpu

_LANES = 128
_SUBLANES = 8


def _round_up(n, m):
    return ((n + m - 1) // m) * m


def _sinusoidal_kernel(x_ref, w_ref, out_ref):
    # x_ref:   (TB, 1)      f32   timesteps for this tile
    # w_ref:   (1, H)       f32   learned frequencies (replicated per tile)
    # out_ref: (TB, W_pad)  f32   [x | sin | cos | zero-pad], W_pad % 128 == 0
    x = x_ref[...]                                  # (TB, 1)
    # Fold the 2*pi scale into the (1, H) weight row once per tile — cheaper
    # than multiplying the full (TB, H) freqs tensor by 2*pi.
    w = w_ref[...] * (2.0 * math.pi)                # (1, H)
    freqs = x * w                                   # (TB, H) VPU broadcast mul

    H = w.shape[1]
    W = 1 + 2 * H
    W_pad = out_ref.shape[1]
    TB = x.shape[0]

    # Direct slice stores (no concatenate, no extra vreg-resident intermediate).
    out_ref[:, 0:1] = x
    out_ref[:, 1:1 + H] = jnp.sin(freqs)
    out_ref[:, 1 + H:W] = jnp.cos(freqs)
    if W_pad > W:  # static (trace-time) condition
        # Keep the padded lanes deterministic; wrapper slices them away.
        out_ref[:, W:] = jnp.zeros((TB, W_pad - W), jnp.float32)


def learned_sinusoidal_pos_emb(x, weights, *, block_rows=None):
    """x: (B,) float; weights: (H,) float -> (B, 1 + 2H) float32."""
    B = x.shape[0]
    H = weights.shape[0]
    W = 1 + 2 * H

    # Row tile: multiple of 8 (f32 sublane rule). Cap at 512 rows — reaches
    # the measured ~85% HBM-roofline regime while staying far below the
    # scoped VMEM limit even on v7x (64 MiB) with double buffering.
    if block_rows is None:
        block_rows = min(512, _round_up(B, _SUBLANES))
    TB = _round_up(block_rows, _SUBLANES)

    B_pad = _round_up(B, TB)
    W_pad = _round_up(W, _LANES)  # lane-dense output block width

    x2d = jnp.pad(x.astype(jnp.float32), (0, B_pad - B)).reshape(B_pad, 1)
    w2d = weights.reshape(1, H).astype(jnp.float32)

    out_padded = pl.pallas_call(
        _sinusoidal_kernel,
        out_shape=jax.ShapeDtypeStruct((B_pad, W_pad), jnp.float32),
        grid=(B_pad // TB,),
        in_specs=[
            pl.BlockSpec((TB, 1), lambda i: (i, 0)),   # x tile
            pl.BlockSpec((1, H), lambda i: (0, 0)),    # weights, replicated
        ],
        out_specs=pl.BlockSpec((TB, W_pad), lambda i: (i, 0)),
        compiler_params=pltpu.CompilerParams(
            dimension_semantics=("parallel",),  # shard batch tiles across TCs (v7x)
        ),
    )(x2d, w2d)

    return out_padded[:B, :W]


def reference(x, weights):
    # Literal transcription of the PyTorch forward.
    xc = x.reshape(-1, 1).astype(jnp.float32)
    freqs = xc * weights.reshape(1, -1).astype(jnp.float32) * 2.0 * math.pi
    return jnp.concatenate([xc, jnp.sin(freqs), jnp.cos(freqs)], axis=-1)


if __name__ == "__main__":
    key = jax.random.PRNGKey(0)
    kx, kw = jax.random.split(key)

    B = 8          # batch of timesteps
    dim = 32       # module's `dim` (must be even)
    half_dim = dim // 2

    # Deterministic "parameter" init: torch.randn(half_dim) analogue.
    weights = jax.random.normal(kw, (half_dim,), dtype=jnp.float32)
    # Continuous-time noise levels in [0, 1) (typical input to this module).
    x = jax.random.uniform(kx, (B,), dtype=jnp.float32)

    out = learned_sinusoidal_pos_emb(x, weights)
    out = jax.block_until_ready(out)

    ref = reference(x, weights)
    assert out.shape == (B, dim + 1), out.shape
    assert jnp.allclose(out, ref, atol=1e-4, rtol=1e-4), "mismatch vs reference"

    print("KERNEL_OK")
</pallas_src>

<mosaic_0001>
module attributes {stable_mosaic.version = 11 : i64} {
  func.func @_sinusoidal_kernel(%arg0: i32, %arg1: memref<8x1xf32, #tpu.memory_space<vmem>>, %arg2: memref<1x16xf32, #tpu.memory_space<vmem>>, %arg3: memref<8x128xf32, #tpu.memory_space<vmem>>) attributes {dimension_semantics = [#tpu.dimension_semantics<parallel>], iteration_bounds = array<i64: 1>, scalar_prefetch = 0 : i64, scratch_operands = 0 : i64, tpu.core_type = #tpu.core_type<tc>, window_params = [{transform_indices = @transform_0, window_bounds = array<i64: 8, 1>}, {pipeline_mode = #tpu.pipeline_mode<synchronous>, transform_indices = @transform_1, window_bounds = array<i64: 1, 16>}, {transform_indices = @transform_2, window_bounds = array<i64: 8, 128>}]} {
    %c0 = arith.constant 0 : index
    %c0_0 = arith.constant 0 : index
    %0 = vector.load %arg1[%c0, %c0_0] : memref<8x1xf32, #tpu.memory_space<vmem>>, vector<8x1xf32>
    %c0_1 = arith.constant 0 : index
    %c0_2 = arith.constant 0 : index
    %1 = vector.load %arg2[%c0_1, %c0_2] : memref<1x16xf32, #tpu.memory_space<vmem>>, vector<1x16xf32>
    %cst = arith.constant 6.28318548 : f32
    %2 = vector.broadcast %cst : f32 to vector<1x16xf32>
    %3 = arith.mulf %1, %2 : vector<1x16xf32>
    %4 = vector.broadcast %0 : vector<8x1xf32> to vector<8x16xf32>
    %5 = vector.broadcast %3 : vector<1x16xf32> to vector<8x16xf32>
    %6 = arith.mulf %4, %5 : vector<8x16xf32>
    %c0_3 = arith.constant 0 : index
    %c0_4 = arith.constant 0 : index
    %7 = vector.load %arg3[%c0_3, %c0_4] : memref<8x128xf32, #tpu.memory_space<vmem>>, vector<8x1xf32>
    tpu.vector_store %arg3[%c0_3, %c0_4], %0 {strides = array<i32>} : memref<8x128xf32, #tpu.memory_space<vmem>>, vector<8x1xf32>,
    %8 = math.sin %6 : vector<8x16xf32>
    %c0_5 = arith.constant 0 : index
    %c1 = arith.constant 1 : index
    %9 = vector.load %arg3[%c0_5, %c1] : memref<8x128xf32, #tpu.memory_space<vmem>>, vector<8x16xf32>
    tpu.vector_store %arg3[%c0_5, %c1], %8 {strides = array<i32>} : memref<8x128xf32, #tpu.memory_space<vmem>>, vector<8x16xf32>,
    %10 = math.cos %6 : vector<8x16xf32>
    %c0_6 = arith.constant 0 : index
    %c17 = arith.constant 17 : index
    %11 = vector.load %arg3[%c0_6, %c17] : memref<8x128xf32, #tpu.memory_space<vmem>>, vector<8x16xf32>
    tpu.vector_store %arg3[%c0_6, %c17], %10 {strides = array<i32>} : memref<8x128xf32, #tpu.memory_space<vmem>>, vector<8x16xf32>,
    %cst_7 = arith.constant 0.000000e+00 : f32
    %12 = vector.broadcast %cst_7 : f32 to vector<8x95xf32>
    %c0_8 = arith.constant 0 : index
    %c33 = arith.constant 33 : index
    %13 = vector.load %arg3[%c0_8, %c33] : memref<8x128xf32, #tpu.memory_space<vmem>>, vector<8x95xf32>
    tpu.vector_store %arg3[%c0_8, %c33], %12 {strides = array<i32>} : memref<8x128xf32, #tpu.memory_space<vmem>>, vector<8x95xf32>,
    return
  }
  func.func @transform_0(%arg0: i32) -> (i32, i32) {
    %c0_i32 = arith.constant 0 : i32
    %c0_i32_0 = arith.constant 0 : i32
    return %arg0, %c0_i32 : i32, i32
  }
  func.func @transform_1(%arg0: i32) -> (i32, i32) {
    %c0_i32 = arith.constant 0 : i32
    %c0_i32_0 = arith.constant 0 : i32
    %c0_i32_1 = arith.constant 0 : i32
    return %c0_i32, %c0_i32_0 : i32, i32
  }
  func.func @transform_2(%arg0: i32) -> (i32, i32) {
    %c0_i32 = arith.constant 0 : i32
    %c0_i32_0 = arith.constant 0 : i32
    return %arg0, %c0_i32 : i32, i32
  }
}

</mosaic_0001>

<bundles_post_ra>
// kernel: tpu_custom_call.1
= control target key start
LH: loop header
LB: loop body
LE: loop exit
PB: predicated region body
PF: predicated region fallthrough
CT: control target
= control target key end

     0   :  { %vm27_vm0 = vcmask 7168   ;;  %v316_v1 = vmov 0   ;;  %s381_s0 = inlined_call_operand.vmem [shape: f32[8,1], index: 0, kind: input, shape index: {}]   ;;  %s382_s1 = inlined_call_operand.vmem [shape: f32[1,16], index: 1, kind: input, shape index: {}]   ;;  %s383_s2 = inlined_call_operand.hbm [shape: f32[8,128], index: 2, kind: output, shape index: {}]  }
   0x1   :  { %v12_v0 = vld [vmem:[%s381_s0] sm:$0xff]  ;;  %287 = vset.pattern.permute.xlu0 %v316_v1 }
   0x2   :  { %28 = vst.msk [vmem:[#allocation2] sm:$0xff] %vm27_vm0, %v12_v0  ;;  %17 = vperm.xlu0 %287, %v12_v0  }
   0x3   :  { %7 = vsyncpa [#allocation3], 0  ;;  %v21_v2 = vlaneseq  ;;  %v13_v4 = vld [vmem:[%s382_s1] sm:$0x1]  ;;  %v317_v21 = vmov 2102212464  }
   0x4   :  { %v14_v5 = vmul.f32 6.2831855, %v13_v4  ;;  %v318_v23 = vmov 920167782   ;;  %v319_v27 = vmov 1326507024  }
   0x5   :  { %v22_v3 = vshrl.u32 %v21_v2, 7  ;;  %v320_v29 = vmov 683565275   ;;  %v321_v31 = vmov 2475754826   ;;  %s323_s0 = smov 17  }
   0x6   :  { %v322_v34 = vmov 2131351028   ;;  %s324_s1 = smov 1   ;;  %s325_s13 = smov [#allocation2]  }
   0x7   :  { %v23_v6 = vsub.s32 0, %v22_v3  ;;  %s256_s14 = sshll.u32 %s325_s13, 4  ;;  %s257_s14 = int_to_ptr.vmem [resolvable:$true] %s256_s14 }
   0x8   :  { %s292_s15 = scalar_lea.vmem %s257_s14, 128  ;;  %p297_p1 = scmp.lt.s32.totalorder %s257_s14, %s257_s14 }
   0x9   :  { %v24_v7 = vrot.slane %v14_v5, %v23_v6  ;;  %p293_p0 = scmp.ne.s32.totalorder %s257_s14, %s292_s15  ;;  %p298_p2 = scmp.lt.s32.totalorder %s292_s15, %s292_s15 }
   0xb   :  { %p299_p3 = por %p298_p2, %p297_p1 }
   0xd   :  { %p300_p4 = pnand %p299_p3, %p293_p0 }
  0x81   :  { %v18_v8 = vpop.permute.xlu0 %17 }
  0x82   :  { %v348_v9 = vmul.f32 %v24_v7, %v18_v8 }
  0x84   :  { %v32_v10 = vand.u32 2139095040, %v348_v9  ;;  %v29_v11 = vand.u32 2147483647, %v348_v9  ;;  %vm31_vm8 = vcmp.lt.s32.totalorder %v348_v9, 0  ;;  %vm121_vm0 = vweird.f32 %v348_v9 }
  0x86   :  { %v33_v12 = vshrl.u32 %v32_v10, 23  ;;  %v36_v14 = vand.u32 8388607, %v29_v11  ;;  %vm30_vm9 = vcmp.le.f32.partialorder %v29_v11, 0.7853982 }
  0x88   :  { %v264_v13 = vadd.s32 4294967169, %v33_v12  ;;  %v37_v17 = vor.u32 8388608, %v36_v14 }
  0x8a   :  { %v39_v15 = vadd.s32 1, %v264_v13  ;;  %v77_v25 = vshll.u32 %v37_v17, 8 }
  0x8c   :  { %vm40_vm1 = vcmp.gt.s32.totalorder %v39_v15, 0 }
  0x8d   :  { %v41_v16 = vsel %vm40_vm1, %v39_v15, 0  ;;  %vm137_vm1 = vcmask 138248  }
  0x8e   :  { %v43_v18 = vand.u32 31, %v41_v16  ;;  %v42_v19 = vshrl.u32 %v41_v16, 5 }
  0x90   :  { %v44_v20 = vsub.s32 32, %v43_v18  ;;  %v55_v22 = vshll.u32 %v317_v21, %v43_v18  ;;  %v58_v24 = vshll.u32 %v318_v23, %v43_v18  ;;  %v46_v30 = vshll.u32 %v320_v29, %v43_v18 }
  0x91   :  { %v49_v33 = vshll.u32 %v321_v31, %v43_v18  ;;  %v52_v36 = vshll.u32 %v322_v34, %v43_v18  ;;  %vm64_vm2 = vcmp.lt.s32.totalorder %v42_v19, 4  ;;  %vm61_vm3 = vcmp.lt.s32.totalorder %v42_v19, 1 }
  0x92   :  { %v56_v26 = vshrl.u32 %v318_v23, %v44_v20  ;;  %v59_v28 = vshrl.u32 %v319_v27, %v44_v20  ;;  %v47_v32 = vshrl.u32 %v321_v31, %v44_v20  ;;  %v50_v35 = vshrl.u32 %v322_v34, %v44_v20 }
  0x93   :  { %v53_v37 = vshrl.u32 %v317_v21, %v44_v20  ;;  %v45_v41 = vshrl.u32 %v320_v29, %v44_v20  ;;  %vm62_vm4 = vcmp.lt.s32.totalorder %v42_v19, 2  ;;  %vm63_vm5 = vcmp.lt.s32.totalorder %v42_v19, 3 }
  0x94   :  { %v57_v38 = vor.u32 %v56_v26, %v55_v22  ;;  %v60_v39 = vor.u32 %v59_v28, %v58_v24  ;;  %v48_v40 = vor.u32 %v47_v32, %v46_v30  ;;  %v51_v42 = vor.u32 %v50_v35, %v49_v33 }
  0x95   :  { %v54_v43 = vor.u32 %v53_v37, %v52_v36 }
  0x96   :  { %v70_v44 = vsel %vm64_vm2, %v57_v38, 920167782  ;;  %v74_v45 = vsel %vm64_vm2, %v60_v39, 1326507024  ;;  %v69_v47 = vsel %vm61_vm3, %v48_v40, %v51_v42  ;;  %v65_v50 = vsel %vm61_vm3, %v45_v41, %v48_v40 }
  0x97   :  { %v66_v46 = vsel %vm64_vm2, %v54_v43, 2102212464  ;;  %v71_v48 = vsel %vm63_vm5, %v54_v43, %v70_v44  ;;  %v73_v49 = vsel %vm61_vm3, %v51_v42, %v54_v43  ;;  %v75_v53 = vsel %vm63_vm5, %v57_v38, %v74_v45 }
  0x98   :  { %v67_v51 = vsel %vm63_vm5, %v51_v42, %v66_v46  ;;  %v72_v52 = vsel %vm62_vm4, %v69_v47, %v71_v48  ;;  %v76_v54 = vsel %vm62_vm4, %v73_v49, %v75_v53  ;;  %vm246_vm2 = vcmask 269448  }
  0x99   :  { %v354_v55 = vmul.u32.u64.low %v77_v25, %v72_v52  ;;  %v355_v56 = vmul.u32.u64.high %v77_v25, %v72_v52, %v354_v55  ;;  %v357_v57 = vmul.u32.u64.low %v77_v25, %v76_v54  ;;  %v358_v58 = vmul.u32.u64.high %v77_v25, %v76_v54, %v357_v57 }
  0x9a   :  { %v68_v59 = vsel %vm62_vm4, %v65_v50, %v67_v51  ;;  %vm248_vm3 = vcmask 1047816   ;;  %v326_v45 = vmov 0.0  }
  0x9b   :  { %v87_v60 = vadd.s32 1, %v355_v56  ;;  %v84_v61 = vmul.u32 %v77_v25, %v68_v59  ;;  %vm86_vm6 = vc.u32 %v358_v58, %v354_v55  ;;  %v85_v10 = vadd.s32 %v354_v55, %v358_v58 }
  0x9d   :  { %v88_v62 = vsel %vm86_vm6, %v87_v60, %v355_v56 }
  0x9e   :  { %v89_v63 = vadd.s32 %v88_v62, %v84_v61 }
  0xa0   :  { %v90_v0 = vadd.s32 536870912, %v89_v63 }
  0xa2   :  { %v91_v1 = vshrl.u32 %v90_v0, 30 }
  0xa4   :  { %v92_v2 = vshll.u32 %v91_v1, 30  ;;  %v115_v23 = vsub.s32 4, %v91_v1 }
  0xa6   :  { %v93_v3 = vsub.s32 %v89_v63, %v92_v2  ;;  %v116_v26 = vsel %vm31_vm8, %v115_v23, %v91_v1 }
  0xa7   :  { %v118_v28 = vsel %vm30_vm9, 0, %v116_v26 }
  0xa8   :  { %v95_v4 = vsub.s32 0, %v93_v3  ;;  %v122_v29 = vadd.s32 3, %v118_v28  ;;  %v232_v30 = vand.u32 3, %v118_v28 }
  0xaa   :  { %v265_v5 = vmin.u32 %v95_v4, %v93_v3  ;;  %v123_v31 = vand.u32 3, %v122_v29  ;;  %vm237_vm10 = vcmp.eq.s32.totalorder %v232_v30, 2  ;;  %vm234_vm12 = vcmp.eq.s32.totalorder %v232_v30, 0 }
  0xab   :  { %vm233_vm14 = vcmp.lt.s32.totalorder %v232_v30, 2 }
  0xac   :  { %v97_v6 = vclz %v265_v5  ;;  %vm128_vm11 = vcmp.eq.s32.totalorder %v123_v31, 2  ;;  %vm125_vm13 = vcmp.eq.s32.totalorder %v123_v31, 0  ;;  %vm124_vm15 = vcmp.lt.s32.totalorder %v123_v31, 2 }
  0xae   :  { %v266_v7 = vadd.s32 4294967294, %v97_v6 }
  0xb0   :  { %vm267_vm7 = vcmp.lt.s32.totalorder %v266_v7, 0 }
  0xb1   :  { %v100_v8 = vsel %vm267_vm7, 0, %v266_v7 }
  0xb2   :  { %v101_v12 = vsub.s32 32, %v100_v8  ;;  %v105_v13 = vsub.s32 4294967266, %v100_v8  ;;  %v102_v14 = vshll.u32 %v93_v3, %v100_v8 }
  0xb4   :  { %v103_v15 = vshrl.u32 %v85_v10, %v101_v12  ;;  %v106_v16 = vadd.s32 127, %v105_v13 }
  0xb6   :  { %v104_v17 = vor.u32 %v103_v15, %v102_v14  ;;  %v107_v18 = vshll.u32 %v106_v16, 23 }
  0xb8   :  { %v108_v19 = vor.u32 4788187, %v107_v18  ;;  %v111_v21 = vcvt.s32.f32 %v104_v17 }
  0xba   :  { %v109_v20 = vand.u32 2147483647, %v108_v19 }
  0xbc   :  { %v112_v22 = vmul.f32 %v111_v21, %v109_v20 }
  0xbe   :  { %v113_v24 = vxor.u32 2147483648, %v112_v22 }
  0xc0   :  { %v114_v25 = vsel %vm31_vm8, %v113_v24, %v112_v22 }
  0xc1   :  { %v117_v27 = vsel %vm30_vm9, %v348_v9, %v114_v25 }
  0xc2   :  { %288 = vcosq.f32 %v117_v27 }
  0xc3   :  { %290 = vsinq.f32 %v117_v27 }
  0xcc   :  { %v289_v32 = vpop.eup %288 }
  0xcd   :  { %v291_v33 = vpop.eup %290  ;;  %v129_v34 = vxor.u32 2147483648, %v289_v32 }
  0xce   :  { %v126_v35 = vxor.u32 2147483648, %v291_v33 }
  0xcf   :  { %v239_v36 = vsel %vm237_vm10, %v129_v34, %v291_v33  ;;  %v130_v11 = vsel %vm128_vm11, %v129_v34, %v291_v33 }
  0xd0   :  { %v236_v37 = vsel %vm234_vm12, %v289_v32, %v126_v35  ;;  %v127_v38 = vsel %vm125_vm13, %v289_v32, %v126_v35 }
  0xd1   :  { %v240_v39 = vsel %vm233_vm14, %v236_v37, %v239_v36  ;;  %v131_v40 = vsel %vm124_vm15, %v127_v38, %v130_v11 }
  0xd2   :  { %v241_v41 = vsel %vm121_vm0, nan, %v240_v39  ;;  %v132_v42 = vsel %vm121_vm0, nan, %v131_v40 }
  0xd3   :  { %243 = vrot.lane.b32.xlu1 %v241_v41, %s323_s0  ;;  %134 = vrot.lane.b32.xlu0 %v132_v42, %s324_s1 }
 0x145   :  { %v244_v43 = vpop.permute.xlu1 %243  ;;  %v135_v44 = vpop.permute.xlu0 %134 }
 0x146   :  { %138 = vst.msk [vmem:[#allocation2] sm:$0xff] %vm137_vm1, %v135_v44 }
 0x147   :  { %247 = vst.msk [vmem:[#allocation2] sm:$0xff] %vm246_vm2, %v244_v43 }
 0x148   :  { %249 = vst.msk [vmem:[#allocation2] sm:$0xff] %vm248_vm3, %v326_v45 }
 0x149   :  { %303 = shalt.err (!%p300_p4)
}
 0x14a   :  { %s304_s18 = scalar_lea.hbm %s383_s2, 128 }
 0x14b   :  { %p305_p5 = scmp.ne.s32.totalorder %s383_s2, %s304_s18  ;;  %p308_p6 = scmp.lt.u32.totalorder %s304_s18, %s383_s2 }
 0x14d   :  { %p310_p7 = pnand %p308_p6, %p305_p5 }
 0x14f   :  { %313 = shalt.err (!%p310_p7)
}
 0x150   :  { %259 = dma.vmem_to_hbm [thread:$0]  %s257_s14, 128, %s383_s2, [#allocation3]  }
 0x151   :  { %314 = dma.done.wait [#allocation3], 128  }
 0x152   :  { %315 = vsyncadd [#allocation3], 4294967168 }
 0x153   :  { %263 = vsyncpa [#allocation3], 1 }

</bundles_post_ra>
